<compile_context>
chip_gen: v5e
topology: v5e:2x2
jax: 0.10.0
libtpu: 0.0.40
codegen_flags: <defaults>
</compile_context>

<pallas_src>
import jax
import jax.numpy as jnp
import numpy as np
from jax import lax
from jax.experimental import pallas as pl
from jax.experimental.pallas import tpu as pltpu


# ----------------------------- Pallas kernels -------------------------------

def _reduce_kernel(onehotT_ref, x_ref, cinv_ref, lw_ref, xm_ref, acc_ref):
    """Phase 1: per-core segment-sum over node tiles, then mean scale + Lambda."""
    i = pl.program_id(1)

    @pl.when(i == 0)
    def _():
        acc_ref[...] = jnp.zeros_like(acc_ref)

    # MXU-native [B, tile_n] @ [tile_n, Din] partial segment sum, f32 accum.
    acc_ref[...] += jnp.dot(onehotT_ref[...], x_ref[...],
                            preferred_element_type=jnp.float32)

    @pl.when(i == pl.num_programs(1) - 1)
    def _():
        xm = acc_ref[...] * cinv_ref[...]            # mean (cinv == 1 -> sum)
        # Lambda matmul kept fully f32 (tiny [B,Din]@[Din,Dout]).
        xm_ref[0] = jnp.dot(xm, lw_ref[...], preferred_element_type=jnp.float32)


def _map_kernel(x_ref, onehotT_ref, gwT_ref, gb_ref, xmT_ref, o_ref):
    """Phase 2 (transposed): o^T = Gw^T x^T + b - (Lambda xm)^T onehot^T."""
    # [Dout, Din] x [tile_n, Din] contracted on Din -> [Dout, tile_n].
    g = lax.dot_general(gwT_ref[...], x_ref[...],
                        dimension_numbers=(((1,), (1,)), ((), ())),
                        preferred_element_type=jnp.float32)
    # [Dout, B] @ [B, tile_n] -> per-node gather of Lambda(xm), f32.
    sub = jnp.dot(xmT_ref[...], onehotT_ref[...].astype(jnp.float32),
                  preferred_element_type=jnp.float32)
    # Lane-dense [Dout, tile_n] store (128-lane vst), bf16 writeback.
    o_ref[...] = (g + gb_ref[...] - sub).astype(o_ref.dtype)


# ------------------------------ JAX wrapper ---------------------------------

def prepare_batch(batch, num_graphs, n_pad):
    """Build the transposed membership matrix and inverse counts ONCE per batch."""
    n = batch.shape[0]
    batch_p = jnp.full((n_pad,), -1, jnp.int32).at[:n].set(batch.astype(jnp.int32))
    member = batch_p[None, :] == jnp.arange(num_graphs, dtype=jnp.int32)[:, None]
    onehotT = member.astype(jnp.bfloat16)                     # [B, Npad], exact 0/1
    counts = jnp.sum(member.astype(jnp.float32), axis=1)      # [B]
    counts_inv = (1.0 / jnp.maximum(counts, 1.0))[:, None]    # [B, 1]
    return onehotT, counts_inv


def prepare_node_features(x, n_pad):
    """Pad + cast node features once (hoisted out of the per-layer call path)."""
    n, d = x.shape
    return jnp.zeros((n_pad, d), jnp.bfloat16).at[:n].set(x.astype(jnp.bfloat16))


def deepset_layer_forward(params, x_pad, onehotT, counts_inv, num_nodes, *,
                          aggregation_fn="mean", tile_n=512,
                          out_dtype=jnp.bfloat16, transposed_output=False):
    assert aggregation_fn in ("mean", "sum")   # TODO(synk): 'max' unimplemented
    n_pad, d_in = x_pad.shape
    b = onehotT.shape[0]
    assert onehotT.shape[1] == n_pad and n_pad % tile_n == 0
    d_out = params["gamma_w"].shape[0]
    num_tiles = n_pad // tile_n

    # Phase-1 core split (2x on v7x megacore; harmless serial split elsewhere).
    nc = 2 if (num_tiles >= 2 and num_tiles % 2 == 0) else 1
    tiles_per_core = num_tiles // nc

    gwT = params["gamma_w"].astype(jnp.bfloat16)              # [Dout, Din]
    gb = params["gamma_b"].astype(jnp.float32)[:, None]       # [Dout, 1]
    lw = params["lambda_w"].T.astype(jnp.float32)             # [Din, Dout] (tiny, f32)
    cinv = (counts_inv if aggregation_fn == "mean"
            else jnp.ones_like(counts_inv)).astype(jnp.float32)   # [B, 1]

    # ---- Phase 1: per-graph aggregate + Lambda -> per-core partials ---------
    tile_io1 = tile_n * (d_in + b) * 2
    resident1 = d_in * d_out * 4 + b * 4 + b * d_out * 4 + b * d_in * 4
    vmem1 = int(min(max(4 * tile_io1 + 2 * resident1, 4 << 20), 32 << 20))
    flops1 = 2 * n_pad * b * d_in + nc * 2 * b * d_in * d_out
    bytes1 = n_pad * (d_in + b) * 2 + d_in * d_out * 4 + nc * b * d_out * 4

    xm_partials = pl.pallas_call(
        _reduce_kernel,
        out_shape=jax.ShapeDtypeStruct((nc, b, d_out), jnp.float32),
        grid_spec=pltpu.PrefetchScalarGridSpec(
            num_scalar_prefetch=0,
            grid=(nc, tiles_per_core),
            in_specs=[
                pl.BlockSpec((b, tile_n),                      # onehotT tile (lane-dense)
                             lambda c, i: (0, c * tiles_per_core + i)),
                pl.BlockSpec((tile_n, d_in),                   # x tile
                             lambda c, i: (c * tiles_per_core + i, 0)),
                pl.BlockSpec((b, 1), lambda c, i: (0, 0)),     # counts_inv (resident)
                pl.BlockSpec((d_in, d_out), lambda c, i: (0, 0)),  # Lambda W (resident)
            ],
            out_specs=pl.BlockSpec((1, b, d_out), lambda c, i: (c, 0, 0)),
            scratch_shapes=[pltpu.VMEM((b, d_in), jnp.float32)],
        ),
        compiler_params=pltpu.CompilerParams(
            dimension_semantics=("parallel", "arbitrary"),
            vmem_limit_bytes=vmem1),
        cost_estimate=pl.CostEstimate(
            flops=int(flops1), transcendentals=0, bytes_accessed=int(bytes1)),
    )(onehotT, x_pad, cinv, lw)

    # Combine per-core partials (f32 end-to-end, no bf16 rounding of xm).
    xmT = jnp.sum(xm_partials, axis=0).T                       # [Dout, B] f32

    # ---- Phase 2: y^T = Gw^T x^T + b - (Lambda xm)^T onehot^T ---------------
    out_itemsize = jnp.dtype(out_dtype).itemsize
    tile_io2 = tile_n * (d_in + b) * 2 + tile_n * d_out * out_itemsize
    resident2 = d_out * d_in * 2 + d_out * 4 + d_out * b * 4
    vmem2 = int(min(max(4 * tile_io2 + 2 * resident2, 4 << 20), 32 << 20))
    flops2 = 2 * n_pad * d_in * d_out + 2 * n_pad * b * d_out
    bytes2 = (n_pad * (d_in + b) * 2 + d_out * d_in * 2 + d_out * 4
              + d_out * b * 4 + n_pad * d_out * out_itemsize)

    outT = pl.pallas_call(
        _map_kernel,
        out_shape=jax.ShapeDtypeStruct((d_out, n_pad), out_dtype),
        grid_spec=pltpu.PrefetchScalarGridSpec(
            num_scalar_prefetch=0,
            grid=(num_tiles,),
            in_specs=[
                pl.BlockSpec((tile_n, d_in), lambda i: (i, 0)),   # x tile
                pl.BlockSpec((b, tile_n), lambda i: (0, i)),      # onehotT tile
                pl.BlockSpec((d_out, d_in), lambda i: (0, 0)),    # Gamma W^T (resident)
                pl.BlockSpec((d_out, 1), lambda i: (0, 0)),       # Gamma bias (resident)
                pl.BlockSpec((d_out, b), lambda i: (0, 0)),       # (Lambda xm)^T (resident)
            ],
            out_specs=pl.BlockSpec((d_out, tile_n), lambda i: (0, i)),
        ),
        compiler_params=pltpu.CompilerParams(
            dimension_semantics=("parallel",),
            vmem_limit_bytes=vmem2),
        cost_estimate=pl.CostEstimate(
            flops=int(flops2), transcendentals=0, bytes_accessed=int(bytes2)),
    )(x_pad, onehotT, gwT, gb, xmT)

    if transposed_output:
        return outT                          # [Dout, N_pad] lane-dense slab
    return outT.T[:num_nodes]                # [N, Dout] module-compatible view


# --------------------------- pure-JAX reference ------------------------------

def reference_forward(params, x, batch, num_graphs, aggregation_fn="mean"):
    seg_sum = jax.ops.segment_sum(x, batch, num_segments=num_graphs)
    counts = jax.ops.segment_sum(jnp.ones((x.shape[0],), jnp.float32), batch,
                                 num_segments=num_graphs)
    xm = seg_sum / jnp.maximum(counts, 1.0)[:, None] if aggregation_fn == "mean" else seg_sum
    xm = xm @ params["lambda_w"].T
    g = x @ params["gamma_w"].T + params["gamma_b"]
    return g - xm[batch]


# --------------------------------- main --------------------------------------

if __name__ == "__main__":
    # Small shapes consistent with the module (TOGL uses dim0_out_dim=32, 'mean').
    N, B = 1500, 6                # nodes, graphs (uneven graph sizes)
    in_dim, out_dim = 32, 32
    TILE_N = 512                  # node tile (>=512 per perf review)

    key = jax.random.PRNGKey(0)
    ks = jax.random.split(key, 4)

    x = jax.random.normal(ks[0], (N, in_dim), jnp.float32)
    sizes = np.array([300, 200, 350, 250, 150, 250])
    assert int(sizes.sum()) == N and len(sizes) == B
    batch = jnp.asarray(np.repeat(np.arange(B, dtype=np.int32), sizes))

    s = 0.1
    params = {
        "gamma_w": s * jax.random.normal(ks[1], (out_dim, in_dim), jnp.float32),
        "gamma_b": s * jax.random.normal(ks[2], (out_dim,), jnp.float32),
        "lambda_w": s * jax.random.normal(ks[3], (out_dim, in_dim), jnp.float32),
    }

    n_pad = TILE_N * (-(-N // TILE_N))
    onehotT, counts_inv = prepare_batch(batch, B, n_pad)   # built once per batch
    x_pad = prepare_node_features(x, n_pad)                # pad+cast once, not per call

    out = deepset_layer_forward(params, x_pad, onehotT, counts_inv, N,
                                aggregation_fn="mean", tile_n=TILE_N)
    out = jax.block_until_ready(out)

    ref = reference_forward(params, x, batch, B, aggregation_fn="mean")
    # bf16 activations/output with f32 accumulation -> loose tolerance vs f32 ref.
    np.testing.assert_allclose(np.asarray(out.astype(jnp.float32)),
                               np.asarray(ref), rtol=5e-2, atol=5e-2)

    print("KERNEL_OK")
</pallas_src>

<mosaic_0001>
module attributes {stable_mosaic.version = 11 : i64} {
  func.func @_reduce_kernel(%arg0: i32, %arg1: i32, %arg2: memref<6x512xbf16, #tpu.memory_space<vmem>>, %arg3: memref<512x32xbf16, #tpu.memory_space<vmem>>, %arg4: memref<6x1xf32, #tpu.memory_space<vmem>>, %arg5: memref<32x32xf32, #tpu.memory_space<vmem>>, %arg6: memref<1x6x32xf32, #tpu.memory_space<vmem>>, %arg7: memref<6x32xf32, #tpu.memory_space<vmem>>) attributes {dimension_semantics = [#tpu.dimension_semantics<parallel>, #tpu.dimension_semantics<arbitrary>], iteration_bounds = array<i64: 1, 3>, scalar_prefetch = 0 : i64, scratch_operands = 1 : i64, tpu.core_type = #tpu.core_type<tc>, window_params = [{transform_indices = @transform_0, window_bounds = array<i64: 6, 512>}, {transform_indices = @transform_1, window_bounds = array<i64: 512, 32>}, {pipeline_mode = #tpu.pipeline_mode<synchronous>, transform_indices = @transform_2, window_bounds = array<i64: 6, 1>}, {pipeline_mode = #tpu.pipeline_mode<synchronous>, transform_indices = @transform_3, window_bounds = array<i64: 32, 32>}, {transform_indices = @transform_4, window_bounds = array<i64: 1, 6, 32>}]} {
    %c0_i32 = arith.constant 0 : i32
    %0 = arith.cmpi eq, %arg1, %c0_i32 : i32
    %1 = arith.extui %0 : i1 to i32
    %c0_i32_0 = arith.constant 0 : i32
    %2 = arith.cmpi ne, %1, %c0_i32_0 : i32
    scf.if %2 {
      %cst_9 = arith.constant 0.000000e+00 : f32
      %12 = vector.broadcast %cst_9 : f32 to vector<6x32xf32>
      %c0_10 = arith.constant 0 : index
      %c0_11 = arith.constant 0 : index
      %13 = vector.load %arg7[%c0_10, %c0_11] : memref<6x32xf32, #tpu.memory_space<vmem>>, vector<6x32xf32>
      tpu.vector_store %arg7[%c0_10, %c0_11], %12 {strides = array<i32>} : memref<6x32xf32, #tpu.memory_space<vmem>>, vector<6x32xf32>,
    } else {
    }
    %c0 = arith.constant 0 : index
    %c0_1 = arith.constant 0 : index
    %3 = vector.load %arg7[%c0, %c0_1] : memref<6x32xf32, #tpu.memory_space<vmem>>, vector<6x32xf32>
    %c0_2 = arith.constant 0 : index
    %c0_3 = arith.constant 0 : index
    %4 = vector.load %arg2[%c0_2, %c0_3] : memref<6x512xbf16, #tpu.memory_space<vmem>>, vector<6x512xbf16>
    %c0_4 = arith.constant 0 : index
    %c0_5 = arith.constant 0 : index
    %5 = vector.load %arg3[%c0_4, %c0_5] : memref<512x32xbf16, #tpu.memory_space<vmem>>, vector<512x32xbf16>
    %cst = arith.constant dense<0.000000e+00> : vector<6x32xf32>
    %6 = tpu.matmul %4, %5, %cst {dimension_numbers = #tpu.dot_dimension_numbers<[1], [0], [0], [1], [0, 0, 1, 1], [], []>} : vector<6x512xbf16>, vector<512x32xbf16>, vector<6x32xf32> -> vector<6x32xf32>
    %7 = arith.addf %3, %6 : vector<6x32xf32>
    %c0_6 = arith.constant 0 : index
    %c0_7 = arith.constant 0 : index
    %8 = vector.load %arg7[%c0_6, %c0_7] : memref<6x32xf32, #tpu.memory_space<vmem>>, vector<6x32xf32>
    tpu.vector_store %arg7[%c0_6, %c0_7], %7 {strides = array<i32>} : memref<6x32xf32, #tpu.memory_space<vmem>>, vector<6x32xf32>,
    %c2_i32 = arith.constant 2 : i32
    %9 = arith.cmpi eq, %arg1, %c2_i32 : i32
    %10 = arith.extui %9 : i1 to i32
    %c0_i32_8 = arith.constant 0 : i32
    %11 = arith.cmpi ne, %10, %c0_i32_8 : i32
    scf.if %11 {
      %c0_9 = arith.constant 0 : index
      %c0_10 = arith.constant 0 : index
      %12 = vector.load %arg7[%c0_9, %c0_10] : memref<6x32xf32, #tpu.memory_space<vmem>>, vector<6x32xf32>
      %c0_11 = arith.constant 0 : index
      %c0_12 = arith.constant 0 : index
      %13 = vector.load %arg4[%c0_11, %c0_12] : memref<6x1xf32, #tpu.memory_space<vmem>>, vector<6x1xf32>
      %14 = vector.broadcast %13 : vector<6x1xf32> to vector<6x32xf32>
      %15 = arith.mulf %12, %14 : vector<6x32xf32>
      %c0_13 = arith.constant 0 : index
      %c0_14 = arith.constant 0 : index
      %16 = vector.load %arg5[%c0_13, %c0_14] : memref<32x32xf32, #tpu.memory_space<vmem>>, vector<32x32xf32>
      %cst_15 = arith.constant dense<0.000000e+00> : vector<6x32xf32>
      %17 = tpu.matmul %15, %16, %cst_15 {dimension_numbers = #tpu.dot_dimension_numbers<[1], [0], [0], [1], [0, 0, 1, 1], [], []>} : vector<6x32xf32>, vector<32x32xf32>, vector<6x32xf32> -> vector<6x32xf32>
      %c0_16 = arith.constant 0 : index
      %c0_17 = arith.constant 0 : index
      %c0_18 = arith.constant 0 : index
      %18 = vector.load %arg6[%c0_16, %c0_17, %c0_18] : memref<1x6x32xf32, #tpu.memory_space<vmem>>, vector<1x6x32xf32>
      %19 = vector.shape_cast %18 : vector<1x6x32xf32> to vector<6x32xf32>
      %20 = vector.shape_cast %17 : vector<6x32xf32> to vector<1x6x32xf32>
      tpu.vector_store %arg6[%c0_16, %c0_17, %c0_18], %20 {strides = array<i32>} : memref<1x6x32xf32, #tpu.memory_space<vmem>>, vector<1x6x32xf32>,
    } else {
    }
    return
  }
  func.func @transform_0(%arg0: i32, %arg1: i32) -> (i32, i32) {
    %c3_i32 = arith.constant 3 : i32
    %0 = arith.muli %arg0, %c3_i32 : i32
    %1 = arith.addi %0, %arg1 : i32
    %c0_i32 = arith.constant 0 : i32
    %c0_i32_0 = arith.constant 0 : i32
    return %c0_i32, %1 : i32, i32
  }
  func.func @transform_1(%arg0: i32, %arg1: i32) -> (i32, i32) {
    %c3_i32 = arith.constant 3 : i32
    %0 = arith.muli %arg0, %c3_i32 : i32
    %1 = arith.addi %0, %arg1 : i32
    %c0_i32 = arith.constant 0 : i32
    %c0_i32_0 = arith.constant 0 : i32
    return %1, %c0_i32 : i32, i32
  }
  func.func @transform_2(%arg0: i32, %arg1: i32) -> (i32, i32) {
    %c0_i32 = arith.constant 0 : i32
    %c0_i32_0 = arith.constant 0 : i32
    %c0_i32_1 = arith.constant 0 : i32
    return %c0_i32, %c0_i32_0 : i32, i32
  }
  func.func @transform_3(%arg0: i32, %arg1: i32) -> (i32, i32) {
    %c0_i32 = arith.constant 0 : i32
    %c0_i32_0 = arith.constant 0 : i32
    %c0_i32_1 = arith.constant 0 : i32
    return %c0_i32, %c0_i32_0 : i32, i32
  }
  func.func @transform_4(%arg0: i32, %arg1: i32) -> (i32, i32, i32) {
    %c0_i32 = arith.constant 0 : i32
    %c0_i32_0 = arith.constant 0 : i32
    %c0_i32_1 = arith.constant 0 : i32
    return %arg0, %c0_i32, %c0_i32_0 : i32, i32, i32
  }
}

</mosaic_0001>

<bundles_post_ra>
// kernel: tpu_custom_call.1
= control target key start
LH: loop header
LB: loop body
LE: loop exit
PB: predicated region body
PF: predicated region fallthrough
CT: control target
= control target key end

     0   :  { %s958_s15 = smov 0   ;;  %s960_s16 = smov 0   ;;  %s1055_s0 = inlined_call_operand.vmem [shape: bf16[6,1536], index: 0, kind: input, shape index: {}]   ;;  %s1056_s1 = inlined_call_operand.vmem [shape: bf16[1536,32], index: 1, kind: input, shape index: {}]   ;;  %s1057_s2 = inlined_call_operand.vmem [shape: f32[6,1], index: 2, kind: input, shape index: {}]   ;;  %s1058_s3 = inlined_call_operand.vmem [shape: f32[32,32], index: 3, kind: input, shape index: {}]   ;;  %s1059_s4 = inlined_call_operand.vmem [shape: f32[1,6,32], index: 4, kind: output, shape index: {}]  }
   0x1   :  { %s962_s17 = smov 0  }
   0x2 LB: > { %s23_s18 = sadd.s32 1, %s925_s16  ;;  %p709_p0 = scmp.ge.s32.totalorder %s929_s17, 1  ;;  %s929_s17 = sphi %s962_s17, %s14_s17   ;;  %s925_s16 = sphi %s960_s16, %s1061_s16   ;;  %s921_s15 = sphi %s958_s15, %s1060_s15  }
   0x3   : > { %p24_p1 = scmp.ge.s32.totalorder %s23_s18, 3  ;;  %p202_p2 = scmp.lt.s32.totalorder %s929_s17, 4 }
   0x5   : > { %s1063_s18 = smov (%p24_p1, %s23_s18), 0  ;;  %p203_p3 = pnand %p709_p0, %p202_p2 }
   0x6   : > { %s710_s19 = sshll.u32 (!%p203_p3), %s921_s15, 2  ;;  %s712_s20 = sshll.u32 (!%p203_p3), %s921_s15, 6 }
   0x7   : > { %206 = sbr.rel (%p203_p3) target bundleno = 443 (0x1bb), region = 36  ;;  %p239_p4 = scmp.lt.s32.totalorder (!%p203_p3), %s710_s19, 11 }
   0x8   : > { %p249_p5 = scmp.lt.s32.totalorder (!%p203_p3), %s712_s20, 191  ;;  %p714_p6 = scmp.ne.s32.totalorder (!%p203_p3), %s921_s15, 0 }
   0xc   : > { %s1065_s19 = smov (!%p239_p4, %s710_s19), 11  ;;  %s1067_s20 = smov (!%p249_p5, %s712_s20), 191 }
   0xd   : > { %s711_s21 = sshll.u32 %s1065_s19, 2  ;;  %s713_s25 = sshll.u32 %s1067_s20, 2 }
   0xe   : > { %s983_s24 = scalar_lea.vmem %s1055_s0, %s711_s21  ;;  %s988_s28 = scalar_lea.vmem %s1056_s1, %s713_s25 }
   0xf   : > { %263 = sbr.rel (%p714_p6) target bundleno = 22 (0x16), region = 40 }
  0x14   : > { %vm264_vm0 = vcmask 259072   ;;  %v931_v0 = vmov 0.0  }
  0x15   : > { %265 = vst.msk [vmem:[#allocation2] sm:$0x3f] %vm264_vm0, %v931_v0 }
  0x16 PF: > { %v855_v1 = vld [vmem:[%s988_s28 + $0x38] sm:$0xff]  ;;  %v854_v5 = vld [vmem:[%s988_s28 + $0x30] sm:$0xff]  ;;  %v853_v9 = vld [vmem:[%s988_s28 + $0x28] sm:$0xff]  ;;  %vm592_vm1 = vcmask 259072   ;;  %p843_p7 = scmp.ne.s32.totalorder %s921_s15, 2 }
  0x17   : > { %v863_v2 = vld [vmem:[%s988_s28 + $0x78] sm:$0xff]  ;;  %539 = vmatpush.bf16.msra.mxu0 %v855_v1  ;;  %v862_v6 = vld [vmem:[%s988_s28 + $0x70] sm:$0xff]  ;;  %v861_v10 = vld [vmem:[%s988_s28 + $0x68] sm:$0xff] }
  0x18   : > { %v871_v3 = vld [vmem:[%s988_s28 + $0xb8] sm:$0xff]  ;;  %552 = vmatpush.bf16.msra.mxu1 %v863_v2  ;;  %v870_v7 = vld [vmem:[%s988_s28 + $0xb0] sm:$0xff]  ;;  %v869_v11 = vld [vmem:[%s988_s28 + $0xa8] sm:$0xff] }
  0x19   : > { %v879_v4 = vld [vmem:[%s988_s28 + $0xf8] sm:$0xff]  ;;  %565 = vmatpush.bf16.msra.mxu2 %v871_v3  ;;  %v878_v8 = vld [vmem:[%s988_s28 + $0xf0] sm:$0xff]  ;;  %v877_v12 = vld [vmem:[%s988_s28 + $0xe8] sm:$0xff] }
  0x1a   : > { %578 = vmatpush.bf16.msra.mxu3 %v879_v4  ;;  %v852_v13 = vld [vmem:[%s988_s28 + $0x20] sm:$0xff]  ;;  %v851_v17 = vld [vmem:[%s988_s28 + $0x18] sm:$0xff]  ;;  %v850_v21 = vld [vmem:[%s988_s28 + $0x10] sm:$0xff] }
  0x1b   : > { %540 = vmatpush.bf16.msra.mxu0 %v854_v5  ;;  %v860_v14 = vld [vmem:[%s988_s28 + $0x60] sm:$0xff]  ;;  %v859_v18 = vld [vmem:[%s988_s28 + $0x58] sm:$0xff]  ;;  %v858_v22 = vld [vmem:[%s988_s28 + $0x50] sm:$0xff] }
  0x1c   : > { %553 = vmatpush.bf16.msra.mxu1 %v862_v6  ;;  %v868_v15 = vld [vmem:[%s988_s28 + $0xa0] sm:$0xff]  ;;  %v867_v19 = vld [vmem:[%s988_s28 + $0x98] sm:$0xff]  ;;  %v866_v23 = vld [vmem:[%s988_s28 + $0x90] sm:$0xff] }
  0x1d   : > { %566 = vmatpush.bf16.msra.mxu2 %v870_v7  ;;  %v876_v16 = vld [vmem:[%s988_s28 + $0xe0] sm:$0xff]  ;;  %v875_v20 = vld [vmem:[%s988_s28 + $0xd8] sm:$0xff]  ;;  %v874_v24 = vld [vmem:[%s988_s28 + $0xd0] sm:$0xff] }
  0x1e   : > { %579 = vmatpush.bf16.msra.mxu3 %v878_v8  ;;  %v849_v25 = vld [vmem:[%s988_s28 + $0x8] sm:$0xff]  ;;  %v267_v27 = vld [vmem:[%s983_s24] sm:$0x77] }
  0x1f   : > { %541 = vmatpush.bf16.msra.mxu0 %v853_v9  ;;  %v857_v26 = vld [vmem:[%s988_s28 + $0x48] sm:$0xff]  ;;  %v335_v31 = vunpack.c.l.b16 %v267_v27  ;;  %v336_v32 = vunpack.c.h.b16 %v267_v27  ;;  %v848_v33 = vld [vmem:[%s988_s28] sm:$0xff] }
  0x20   : > { %554 = vmatpush.bf16.msra.mxu1 %v861_v10  ;;  %v865_v28 = vld [vmem:[%s988_s28 + $0x88] sm:$0xff]  ;;  %v856_v34 = vld [vmem:[%s988_s28 + $0x40] sm:$0xff] }
  0x21   : > { %567 = vmatpush.bf16.msra.mxu2 %v869_v11  ;;  %v873_v29 = vld [vmem:[%s988_s28 + $0xc8] sm:$0xff]  ;;  %v864_v37 = vld [vmem:[%s988_s28 + $0x80] sm:$0xff]  ;;  %v339_v39 = vpack.c.b16 %v335_v31, %v335_v31  ;;  %v340_v40 = vpack.c.b16 %v336_v32, %v336_v32 }
  0x22   : > { %580 = vmatpush.bf16.msra.mxu3 %v877_v12  ;;  %v268_v30 = vld [vmem:[%s983_s24 + $0x8] sm:$0x77]  ;;  %v872_v38 = vld [vmem:[%s988_s28 + $0xc0] sm:$0xff] }
  0x23   : > { %542 = vmatpush.bf16.msra.mxu0 %v852_v13  ;;  %v337_v35 = vunpack.c.l.b16 %v268_v30  ;;  %v338_v36 = vunpack.c.h.b16 %v268_v30  ;;  %v266_v51 = vld [vmem:[#allocation2] sm:$0x3f] }
  0x24   : > { %555 = vmatpush.bf16.msra.mxu1 %v860_v14 }
  0x25   : > { %568 = vmatpush.bf16.msra.mxu2 %v868_v15  ;;  %v341_v41 = vpack.c.b16 %v337_v35, %v337_v35  ;;  %v342_v42 = vpack.c.b16 %v338_v36, %v338_v36 }
  0x26   : > { %581 = vmatpush.bf16.msra.mxu3 %v876_v16 }
  0x27   : > { %543 = vmatpush.bf16.msra.mxu0 %v851_v17 }
  0x28   : > { %556 = vmatpush.bf16.msra.mxu1 %v859_v18 }
  0x29   : > { %569 = vmatpush.bf16.msra.mxu2 %v867_v19 }
  0x2a   : > { %582 = vmatpush.bf16.msra.mxu3 %v875_v20 }
  0x2b   : > { %544 = vmatpush.bf16.msra.mxu0 %v850_v21 }
  0x2c   : > { %557 = vmatpush.bf16.msra.mxu1 %v858_v22 }
  0x2d   : > { %570 = vmatpush.bf16.msra.mxu2 %v866_v23 }
  0x2e   : > { %583 = vmatpush.bf16.msra.mxu3 %v874_v24 }
  0x2f   : > { %545 = vmatpush.bf16.msra.mxu0 %v849_v25 }
  0x30   : > { %558 = vmatpush.bf16.msra.mxu1 %v857_v26 }
  0x31   : > { %571 = vmatpush.bf16.msra.mxu2 %v865_v28 }
  0x32   : > { %584 = vmatpush.bf16.msra.mxu3 %v873_v29 }
  0x33   : > { %546 = vmatpush.bf16.msra.mxu0 %v848_v33 }
  0x34   : > { %559 = vmatpush.bf16.msra.mxu1 %v856_v34 }
  0x35   : > { %572 = vmatpush.bf16.msra.mxu2 %v864_v37 }
  0x36   : > { %585 = vmatpush.bf16.msra.mxu3 %v872_v38  ;;  %547 = vmatmul.bf16.vlgmr.msra.gmra.mxu0 %v339_v39 }
  0x37   : > { %560 = vmatmul.bf16.vlgmr.msra.gmra.mxu1 %v340_v40 }
  0x38   : > { %573 = vmatmul.bf16.vlgmr.msra.gmra.mxu2 %v341_v41 }
  0x39   : > { %586 = vmatmul.bf16.vlgmr.msra.gmra.mxu3 %v342_v42 }
  0xb3   : > { %v548_v43 = vpop.f32.mrf.mxu0 }
  0xb4   : > { %v561_v44 = vpop.f32.mrf.mxu1 }
  0xb5   : > { %v562_v45 = vadd.f32 %v561_v44, %v548_v43 }
  0xbb   : > { %v574_v46 = vpop.f32.mrf.mxu2  ;;  %v550_v49 = vpop.f32.mrf.mxu0 }
  0xbc   : > { %v587_v47 = vpop.f32.mrf.mxu3  ;;  %v575_v48 = vadd.f32 %v574_v46, %v562_v45  ;;  %v563_v50 = vpop.f32.mrf.mxu1 }
  0xbe   : > { %v588_v52 = vadd.f32 %v587_v47, %v575_v48 }
  0xc0   : > { %v591_v53 = vadd.f32 %v588_v52, %v266_v51  ;;  %597 = sbr.rel (%p843_p7) target bundleno = 443 (0x1bb), region = 44 }
  0xc2   : > { %593 = vst.msk [vmem:[#allocation2] sm:$0x3f] %vm592_vm1, %v591_v53 }
  0xc3   : > { %v576_v54 = vpop.f32.mrf.mxu2 }
  0xc4   : > { %v589_v55 = vpop.f32.mrf.mxu3 }
  0xc5   : > { %v599_v56 = vld [vmem:[%s1057_s2] sm:$0x3f]  ;;  %v609_v57 = vld [vmem:[%s1058_s3 + $0x18] sm:$0xff]  ;;  %v608_v58 = vld [vmem:[%s1058_s3 + $0x10] sm:$0xff]  ;;  %v932_v59 = vmov 0   ;;  %vm610_vm2 = vcmask 261120  }
  0xc6   : > { %906 = vset.pattern.permute.xlu0 %v932_v59  ;;  %626 = vmatpush.msra.mxu0 %v609_v57  ;;  %v607_v60 = vld [vmem:[%s1058_s3 + $0x8] sm:$0xff]  ;;  %v606_v61 = vld [vmem:[%s1058_s3] sm:$0xff] }
  0xc7   : > { %602 = vperm.xlu0 %906, %v599_v56  }
  0xc8   : > { %627 = vmatpush.msra.mxu0 %v608_v58 }
  0xc9   : > { %v598_v62 = vld [vmem:[#allocation2] sm:$0x3f] }
  0xca   : > { %628 = vmatpush.msra.mxu0 %v607_v60 }
  0xcc   : > { %629 = vmatpush.msra.mxu0 %v606_v61 }
 0x139   : > { %v603_v63 = vpop.permute.xlu0 %602 }
 0x13a   : > { %v605_v0 = vmul.f32 %v603_v63, %v598_v62 }
 0x13c   : > { %844 = vmatmul.msk.f32.vlgmr.msra.gmra.mxu0 %vm610_vm2, %v605_v0 }
 0x1b9   : > { %v631_v1 = vpop.f32.mrf.mxu0 }
 0x1ba   : > { %634 = vst.msk [vmem:[%s1059_s4] sm:$0x3f] %vm592_vm1, %v631_v1 }
 0x1bb PF: > { %s14_s17 = sadd.s32 1, %s929_s17   ;;  %s1060_s15 = smov %s925_s16 }
 0x1bc   : > { %p11_p8 = scmp.ge.s32.totalorder %s14_s17, 5   ;;  %s1061_s16 = smov %s1063_s18 }
 0x1be   :  { %13 = sbr.rel (!%p11_p8) target bundleno = 2 (0x2), region = 77 }

</bundles_post_ra>
